<compile_context>
chip_gen: v6e
topology: v6e:2x2x1
jax: 0.10.0
libtpu: 0.0.40
codegen_flags: <defaults>
</compile_context>

<pallas_src>
import jax
import jax.numpy as jnp
from jax import lax
from jax.experimental import pallas as pl
from jax.experimental.pallas import tpu as pltpu

LN_EPS = 1e-5  # PyTorch nn.LayerNorm default


def classifier_kernel(x_ref, w1_ref, b1_ref, w2_ref, b2_ref, o_ref):
    # ---- Linear(d_inp, d_hid): bf16 operands, f32 MXU accumulation ----
    h = jnp.dot(x_ref[...], w1_ref[...],
                preferred_element_type=jnp.float32) + b1_ref[...]
    # ---- Tanh (EUP, f32) ----
    h = jnp.tanh(h)
    # ---- LayerNorm(d_hid): biased variance, eps=1e-5. The affine transform
    #      (gamma/beta) is folded into W2/b2 in the wrapper, so only normalize.
    mu = jnp.mean(h, axis=-1, keepdims=True)
    xc = h - mu
    var = jnp.mean(xc * xc, axis=-1, keepdims=True)
    hn = xc * lax.rsqrt(var + LN_EPS)
    # ---- Dropout: identity in eval-mode forward ----
    # TODO(synk): training-mode dropout would need pltpu.prng_* masking; skipped (eval).
    # ---- Linear(d_hid, n_classes_padded): bf16 operands, f32 accumulation ----
    logits = jnp.dot(hn.astype(w2_ref.dtype), w2_ref[...],
                     preferred_element_type=jnp.float32) + b2_ref[...]
    o_ref[...] = logits.astype(o_ref.dtype)


def classifier_forward(x, w1, b1, gamma, beta, w2, b2, *, tb=256):
    B, d_inp = x.shape
    d_hid = w1.shape[1]
    n_classes = w2.shape[1]

    # Fold LayerNorm's affine into the second linear (exact for eval-mode dropout):
    #   (hn*gamma + beta) @ W2 + b2 == hn @ (diag(gamma) @ W2) + (beta @ W2 + b2)
    w2_fold = gamma.reshape(d_hid, 1).astype(jnp.float32) * w2.astype(jnp.float32)
    b2_fold = (beta.reshape(1, d_hid).astype(jnp.float32) @ w2.astype(jnp.float32)
               + b2.reshape(1, n_classes).astype(jnp.float32))

    # Lane-dense output: pad n_classes up to a multiple of 128 (slice outside).
    n_pad = max(128, ((n_classes + 127) // 128) * 128)
    w2_p = jnp.zeros((d_hid, n_pad), jnp.float32).at[:, :n_classes].set(w2_fold)
    b2_p = jnp.zeros((1, n_pad), jnp.float32).at[:, :n_classes].set(b2_fold)

    # bf16 MXU operands (accumulation stays f32 inside the kernel).
    x_bf = x.astype(jnp.bfloat16)
    w1_bf = w1.astype(jnp.bfloat16)
    w2_bf = w2_p.astype(jnp.bfloat16)
    b1_f = b1.reshape(1, d_hid).astype(jnp.float32)

    # Batch tiling: TB rows per grid step (multiple of 8 sublanes), pad B up.
    TB = int(min(tb, ((B + 7) // 8) * 8))
    n_tiles = pl.cdiv(B, TB)
    B_pad = n_tiles * TB
    if B_pad != B:
        x_bf = jnp.pad(x_bf, ((0, B_pad - B), (0, 0)))

    out = pl.pallas_call(
        classifier_kernel,
        out_shape=jax.ShapeDtypeStruct((B_pad, n_pad), jnp.float32),
        grid_spec=pltpu.PrefetchScalarGridSpec(
            num_scalar_prefetch=0,
            grid=(n_tiles,),
            in_specs=[
                pl.BlockSpec((TB, d_inp), lambda i: (i, 0)),     # x tile (streamed)
                pl.BlockSpec((d_inp, d_hid), lambda i: (0, 0)),  # W1 (VMEM-resident)
                pl.BlockSpec((1, d_hid), lambda i: (0, 0)),      # b1 (resident)
                pl.BlockSpec((d_hid, n_pad), lambda i: (0, 0)),  # W2' (resident)
                pl.BlockSpec((1, n_pad), lambda i: (0, 0)),      # b2' (resident)
            ],
            out_specs=pl.BlockSpec((TB, n_pad), lambda i: (i, 0)),
        ),
        compiler_params=pltpu.CompilerParams(
            # batch tiles are independent -> shard across both TCs on v7x megacore
            dimension_semantics=("parallel",)),
    )(x_bf, w1_bf, b1_f, w2_bf, b2_p)

    return out[:B, :n_classes]


def reference_forward_f32(x, w1, b1, gamma, beta, w2, b2):
    """Pure f32 PyTorch-equivalent forward (loose sanity check)."""
    h = jnp.tanh(x @ w1 + b1.reshape(1, -1))
    mu = jnp.mean(h, axis=-1, keepdims=True)
    var = jnp.mean((h - mu) ** 2, axis=-1, keepdims=True)
    hn = (h - mu) * lax.rsqrt(var + LN_EPS) * gamma.reshape(1, -1) + beta.reshape(1, -1)
    return hn @ w2 + b2.reshape(1, -1)


def reference_forward_mixed(x, w1, b1, gamma, beta, w2, b2):
    """Mirrors the kernel's bf16-operand / affine-folded math (tight check)."""
    d_hid = w1.shape[1]
    w2_fold = gamma.reshape(d_hid, 1) * w2
    b2_fold = beta.reshape(1, d_hid) @ w2 + b2.reshape(1, -1)
    h = jnp.dot(x.astype(jnp.bfloat16), w1.astype(jnp.bfloat16),
                preferred_element_type=jnp.float32) + b1.reshape(1, -1)
    h = jnp.tanh(h)
    mu = jnp.mean(h, axis=-1, keepdims=True)
    xc = h - mu
    var = jnp.mean(xc * xc, axis=-1, keepdims=True)
    hn = xc * lax.rsqrt(var + LN_EPS)
    return jnp.dot(hn.astype(jnp.bfloat16), w2_fold.astype(jnp.bfloat16),
                   preferred_element_type=jnp.float32) + b2_fold


if __name__ == "__main__":
    # Shapes consistent with the module: d_inp=32, d_hid=512 (default), n_classes=8.
    B, d_inp, d_hid, n_classes = 200, 32, 512, 8

    key = jax.random.PRNGKey(0)
    kx, kw1, kb1, kg, kbt, kw2, kb2 = jax.random.split(key, 7)

    x = jax.random.normal(kx, (B, d_inp), jnp.float32)

    lim1 = 1.0 / (d_inp ** 0.5)
    w1 = jax.random.uniform(kw1, (d_inp, d_hid), jnp.float32, -lim1, lim1)
    b1 = jax.random.uniform(kb1, (d_hid,), jnp.float32, -lim1, lim1)
    # non-trivial LayerNorm affine to exercise the W2/b2 folding
    gamma = 1.0 + 0.1 * jax.random.normal(kg, (d_hid,), jnp.float32)
    beta = 0.05 * jax.random.normal(kbt, (d_hid,), jnp.float32)
    lim2 = 1.0 / (d_hid ** 0.5)
    w2 = jax.random.uniform(kw2, (d_hid, n_classes), jnp.float32, -lim2, lim2)
    b2 = jax.random.uniform(kb2, (n_classes,), jnp.float32, -lim2, lim2)

    # tb=64 exercises multi-step batch tiling + batch padding (B=200 -> 4 tiles of 64).
    out = classifier_forward(x, w1, b1, gamma, beta, w2, b2, tb=64)
    out = jax.block_until_ready(out)
    assert out.shape == (B, n_classes)

    ref_mixed = reference_forward_mixed(x, w1, b1, gamma, beta, w2, b2)
    ref_f32 = reference_forward_f32(x, w1, b1, gamma, beta, w2, b2)

    assert jnp.allclose(out, ref_mixed, atol=1e-2, rtol=1e-2), \
        "mismatch vs mixed-precision reference"
    assert jnp.allclose(out, ref_f32, atol=1e-1, rtol=1e-1), \
        "mismatch vs f32 reference"

    print("KERNEL_OK")
</pallas_src>

<mosaic_0001>
module attributes {stable_mosaic.version = 11 : i64} {
  func.func @classifier_kernel(%arg0: i32, %arg1: memref<64x32xbf16, #tpu.memory_space<vmem>>, %arg2: memref<32x512xbf16, #tpu.memory_space<vmem>>, %arg3: memref<1x512xf32, #tpu.memory_space<vmem>>, %arg4: memref<512x128xbf16, #tpu.memory_space<vmem>>, %arg5: memref<1x128xf32, #tpu.memory_space<vmem>>, %arg6: memref<64x128xf32, #tpu.memory_space<vmem>>) attributes {dimension_semantics = [#tpu.dimension_semantics<parallel>], iteration_bounds = array<i64: 4>, scalar_prefetch = 0 : i64, scratch_operands = 0 : i64, tpu.core_type = #tpu.core_type<tc>, window_params = [{transform_indices = @transform_0, window_bounds = array<i64: 64, 32>}, {pipeline_mode = #tpu.pipeline_mode<synchronous>, transform_indices = @transform_1, window_bounds = array<i64: 32, 512>}, {pipeline_mode = #tpu.pipeline_mode<synchronous>, transform_indices = @transform_2, window_bounds = array<i64: 1, 512>}, {pipeline_mode = #tpu.pipeline_mode<synchronous>, transform_indices = @transform_3, window_bounds = array<i64: 512, 128>}, {pipeline_mode = #tpu.pipeline_mode<synchronous>, transform_indices = @transform_4, window_bounds = array<i64: 1, 128>}, {transform_indices = @transform_5, window_bounds = array<i64: 64, 128>}]} {
    %c0 = arith.constant 0 : index
    %c0_0 = arith.constant 0 : index
    %0 = vector.load %arg1[%c0, %c0_0] : memref<64x32xbf16, #tpu.memory_space<vmem>>, vector<64x32xbf16>
    %c0_1 = arith.constant 0 : index
    %c0_2 = arith.constant 0 : index
    %1 = vector.load %arg2[%c0_1, %c0_2] : memref<32x512xbf16, #tpu.memory_space<vmem>>, vector<32x512xbf16>
    %cst = arith.constant dense<0.000000e+00> : vector<64x512xf32>
    %2 = tpu.matmul %0, %1, %cst {dimension_numbers = #tpu.dot_dimension_numbers<[1], [0], [0], [1], [0, 0, 1, 1], [], []>} : vector<64x32xbf16>, vector<32x512xbf16>, vector<64x512xf32> -> vector<64x512xf32>
    %c0_3 = arith.constant 0 : index
    %c0_4 = arith.constant 0 : index
    %3 = vector.load %arg3[%c0_3, %c0_4] : memref<1x512xf32, #tpu.memory_space<vmem>>, vector<1x512xf32>
    %4 = vector.broadcast %3 : vector<1x512xf32> to vector<64x512xf32>
    %5 = arith.addf %2, %4 : vector<64x512xf32>
    %6 = math.tanh %5 : vector<64x512xf32>
    %cst_5 = arith.constant dense<0.000000e+00> : vector<64xf32>
    %7 = vector.multi_reduction <add>, %6, %cst_5 [1] : vector<64x512xf32> to vector<64xf32>
    %8 = vector.shape_cast %7 : vector<64xf32> to vector<64x1xf32>
    %cst_6 = arith.constant 5.120000e+02 : f32
    %9 = vector.broadcast %cst_6 : f32 to vector<64x1xf32>
    %10 = arith.divf %8, %9 : vector<64x1xf32>
    %11 = vector.broadcast %10 : vector<64x1xf32> to vector<64x512xf32>
    %12 = arith.subf %6, %11 : vector<64x512xf32>
    %13 = arith.mulf %12, %12 : vector<64x512xf32>
    %cst_7 = arith.constant dense<0.000000e+00> : vector<64xf32>
    %14 = vector.multi_reduction <add>, %13, %cst_7 [1] : vector<64x512xf32> to vector<64xf32>
    %15 = vector.shape_cast %14 : vector<64xf32> to vector<64x1xf32>
    %cst_8 = arith.constant 5.120000e+02 : f32
    %16 = vector.broadcast %cst_8 : f32 to vector<64x1xf32>
    %17 = arith.divf %15, %16 : vector<64x1xf32>
    %cst_9 = arith.constant 9.99999974E-6 : f32
    %18 = vector.broadcast %cst_9 : f32 to vector<64x1xf32>
    %19 = arith.addf %17, %18 : vector<64x1xf32>
    %20 = math.rsqrt %19 : vector<64x1xf32>
    %21 = vector.broadcast %20 : vector<64x1xf32> to vector<64x512xf32>
    %22 = arith.mulf %12, %21 : vector<64x512xf32>
    %23 = arith.truncf %22 : vector<64x512xf32> to vector<64x512xbf16>
    %c0_10 = arith.constant 0 : index
    %c0_11 = arith.constant 0 : index
    %24 = vector.load %arg4[%c0_10, %c0_11] : memref<512x128xbf16, #tpu.memory_space<vmem>>, vector<512x128xbf16>
    %cst_12 = arith.constant dense<0.000000e+00> : vector<64x128xf32>
    %25 = tpu.matmul %23, %24, %cst_12 {dimension_numbers = #tpu.dot_dimension_numbers<[1], [0], [0], [1], [0, 0, 1, 1], [], []>} : vector<64x512xbf16>, vector<512x128xbf16>, vector<64x128xf32> -> vector<64x128xf32>
    %c0_13 = arith.constant 0 : index
    %c0_14 = arith.constant 0 : index
    %26 = vector.load %arg5[%c0_13, %c0_14] : memref<1x128xf32, #tpu.memory_space<vmem>>, vector<1x128xf32>
    %27 = vector.broadcast %26 : vector<1x128xf32> to vector<64x128xf32>
    %28 = arith.addf %25, %27 : vector<64x128xf32>
    %c0_15 = arith.constant 0 : index
    %c0_16 = arith.constant 0 : index
    %29 = vector.load %arg6[%c0_15, %c0_16] : memref<64x128xf32, #tpu.memory_space<vmem>>, vector<64x128xf32>
    tpu.vector_store %arg6[%c0_15, %c0_16], %28 {strides = array<i32>} : memref<64x128xf32, #tpu.memory_space<vmem>>, vector<64x128xf32>,
    return
  }
  func.func @transform_0(%arg0: i32) -> (i32, i32) {
    %c0_i32 = arith.constant 0 : i32
    %c0_i32_0 = arith.constant 0 : i32
    return %arg0, %c0_i32 : i32, i32
  }
  func.func @transform_1(%arg0: i32) -> (i32, i32) {
    %c0_i32 = arith.constant 0 : i32
    %c0_i32_0 = arith.constant 0 : i32
    %c0_i32_1 = arith.constant 0 : i32
    return %c0_i32, %c0_i32_0 : i32, i32
  }
  func.func @transform_2(%arg0: i32) -> (i32, i32) {
    %c0_i32 = arith.constant 0 : i32
    %c0_i32_0 = arith.constant 0 : i32
    %c0_i32_1 = arith.constant 0 : i32
    return %c0_i32, %c0_i32_0 : i32, i32
  }
  func.func @transform_3(%arg0: i32) -> (i32, i32) {
    %c0_i32 = arith.constant 0 : i32
    %c0_i32_0 = arith.constant 0 : i32
    %c0_i32_1 = arith.constant 0 : i32
    return %c0_i32, %c0_i32_0 : i32, i32
  }
  func.func @transform_4(%arg0: i32) -> (i32, i32) {
    %c0_i32 = arith.constant 0 : i32
    %c0_i32_0 = arith.constant 0 : i32
    %c0_i32_1 = arith.constant 0 : i32
    return %c0_i32, %c0_i32_0 : i32, i32
  }
  func.func @transform_5(%arg0: i32) -> (i32, i32) {
    %c0_i32 = arith.constant 0 : i32
    %c0_i32_0 = arith.constant 0 : i32
    return %arg0, %c0_i32 : i32, i32
  }
}

</mosaic_0001>

<bundles_post_ra>
// kernel: tpu_custom_call.1
= control target key start
LH: loop header
LB: loop body
LE: loop exit
PB: predicated region body
PF: predicated region fallthrough
CT: control target
= control target key end

     0   :  { %10 = vsyncpa [#allocation3], 0  ;;  %s2215_s0 = inlined_call_operand.vmem [shape: bf16[256,32], index: 0, kind: input, shape index: {}]   ;;  %s2216_s1 = inlined_call_operand.vmem [shape: bf16[32,512], index: 1, kind: input, shape index: {}]   ;;  %s2217_s2 = inlined_call_operand.vmem [shape: f32[1,512], index: 2, kind: input, shape index: {}]   ;;  %s2218_s3 = inlined_call_operand.hbm [shape: bf16[512,128], index: 3, kind: input, shape index: {}]   ;;  %s2219_s4 = inlined_call_operand.vmem [shape: f32[1,128], index: 4, kind: input, shape index: {}]   ;;  %s2220_s5 = inlined_call_operand.hbm [shape: f32[256,128], index: 5, kind: output, shape index: {}]  }
   0x1   :  { %11 = vsyncpa [#allocation4], 0 }
   0x2   :  { %13 = vsyncpa [#allocation4 + $0x1], 0  ;;  %s1705_s18 = smov 0   ;;  %s1707_s19 = smov 0  }
   0x3   :  { %s1709_s20 = smov 0   ;;  %s1711_s21 = smov 0  }
   0x4 LB: > { %s1726_s22 = sadd.s32 4294967295, %s1666_s21   ;;  %s1245_s23 = sadd.s32 4294967294, %s1666_s21   ;;  %s1666_s21 = sphi %s1711_s21, %s2228_s21   ;;  %s1662_s20 = sphi %s1709_s20, %s2227_s20   ;;  %s1658_s19 = sphi %s1707_s19, %s2226_s19   ;;  %s1654_s18 = sphi %s1705_s18, %s2225_s18  }
   0x5   : > { %s1730_s24 = sadd.s32 1, %s1666_s21   ;;  %s136_s25 = sadd.s32 1, %s1662_s20 }
   0x6   : > { %s133_s26 = ssub.s32 %s1666_s21, %s1730_s24  ;;  %p146_p0 = scmp.ne.s32.totalorder %s1662_s20, %s1658_s19 }
   0x7   : > { %p134_p1 = scmp.eq.s32.totalorder %s133_s26, 0  ;;  %p147_p2 = scmp.eq.s32.totalorder %s1726_s22, 3 }
   0x8   : > { %p152_p3 = scmp.ne.s32.totalorder %s1658_s19, %s1654_s18  ;;  %p153_p4 = scmp.eq.s32.totalorder %s1245_s23, 3 }
   0x9   : > { %s1741_s27 = scalar_select %p134_p1, %s1662_s20, %s136_s25  }
   0xa   : > { %p1743_p5 = por %p147_p2, %p146_p0  ;;  %p1747_p6 = por %p153_p4, %p152_p3 }
   0xb   : > { %p1246_p7 = scmp.ge.s32.totalorder %s1666_s21, 1  ;;  %p160_p8 = scmp.lt.s32.totalorder %s1666_s21, 5 }
   0xc   : > { %s2222_s29 = scalar_select %p1747_p6, 1, 0 }
   0xd   : > { %p1407_p9 = scmp.eq.s32.totalorder %s1726_s22, 0  ;;  %p1754_p10 = pnand %p1246_p7, %p160_p8 }
   0xe   : > { %s1668_s6 = smov [#allocation2]  }
   0xf   : > { %s178_s7 = sshll.u32 %s1668_s6, 4  ;;  %p1399_p11 = pneg %p1754_p10  ;;  %s179_s7 = int_to_ptr.vmem [resolvable:$true] %s178_s7 }
  0x10   : > { %s1587_s8 = scalar_lea.vmem %s179_s7, 4096  ;;  %p1595_p3 = scmp.lt.s32.totalorder %s179_s7, %s179_s7 }
  0x11   : > { %p1400_p12 = pnand %p1407_p9, %p1399_p11  ;;  %p1588_p0 = scmp.ne.s32.totalorder %s179_s7, %s1587_s8 }
  0x12   : > { %p1596_p4 = scmp.lt.s32.totalorder %s1587_s8, %s1587_s8 }
  0x13   : > { %p1578_p13 = pneg %p1400_p12 }
  0x14   : > { %p1597_p6 = por %p1596_p4, %p1595_p3 }
  0x15   : > { %p1590_p1 = pnand %p1588_p0, %p1578_p13 }
  0x17   : > { %p1591_p2 = pneg %p1590_p1 }
  0x19   : > { %p1598_p7 = pnand %p1597_p6, %p1591_p2 }
  0x1b   : > { %1601 = shalt.err (!%p1598_p7)
}
  0x1c   : > { %s1669_s9 = smov 64   ;;  %s1670_s10 = smov 4  }
  0x1d   : > { %1402 = dma.hbm_to_vmem [thread:$0]  (!%p1400_p12), %s2218_s3, 4096, %s179_s7, [#allocation3], %s1669_s9, %s1669_s9, %s1670_s10  }
  0x1e   : > { %206 = sbr.rel (%p1754_p10) target bundleno = 822 (0x336), region = 40 }
  0x23   : > { %1645 = dma.done.wait (%p1407_p9), [#allocation3], 4096  }
  0x24   : > { %1647 = vsyncadd (%p1407_p9), [#allocation3], 4294963200  ;;  %s1252_s13 = sshll.u32 %s1726_s22, 3  ;;  %v1671_v0 = vmov 0   ;;  %v1448_v1 = vld [vmem:[%s2216_s1 + $0x24] ss:$16 sps:$4 sm:$0xff]   ;;  %v260_v13 = vlaneseq }
  0x25   : > { %385 = vmatprep.mubr.bf16.mxu0 %v1671_v0  ;;  %458 = vmatprep.mubr.bf16.mxu1 %v1671_v0  ;;  %p235_p6 = scmp.lt.s32.totalorder %s1252_s13, 31  ;;  %v1450_v2 = vld [vmem:[%s2216_s1 + $0x2c] ss:$16 sps:$4 sm:$0xff]   ;;  %v1452_v3 = vld [vmem:[%s2216_s1 + $0x20] ss:$16 sps:$4 sm:$0xff]   ;;  %vm340_vm0 = vcmask 261120  }
  0x26   : > { %365 = vmatprep.subr.bf16.mxu0 %v1448_v1  ;;  %v1453_v4 = vld [vmem:[%s2216_s1 + $0x28] ss:$16 sps:$4 sm:$0xff]   ;;  %438 = vmatprep.subr.bf16.mxu1 %v1450_v2  ;;  %v1454_v5 = vld [vmem:[%s2216_s1 + $0x4] ss:$16 sps:$4 sm:$0xff]   ;;  %v1456_v6 = vld [vmem:[%s2216_s1 + $0xc] ss:$16 sps:$4 sm:$0xff]  }
  0x27   : > { %s2230_s13 = smov (!%p235_p6, %s1252_s13), 31  ;;  %366 = vmatpush1.bf16.msra.mxu0 %v1452_v3  ;;  %439 = vmatpush1.bf16.msra.mxu1 %v1453_v4  ;;  %v1458_v7 = vld [vmem:[%s2216_s1] ss:$16 sps:$4 sm:$0xff]   ;;  %v1459_v8 = vld [vmem:[%s2216_s1 + $0x8] ss:$16 sps:$4 sm:$0xff]   ;;  %v261_v14 = vshrl.u32 %v260_v13, 7 }
  0x28   : > { %s1253_s23 = sshll.u32 %s2230_s13, 2  ;;  %367 = vmatprep.subr.bf16.mxu0 %v1454_v5  ;;  %440 = vmatprep.subr.bf16.mxu1 %v1456_v6  ;;  %v258_v17 = vld [vmem:[%s2217_s2] sm:$0xf]  ;;  %s231_s26 = sand.u32 1, %s1658_s19  }
  0x29   : > { %s238_s15 = scalar_lea.vmem %s2215_s0, %s1253_s23  ;;  %v262_v15 = vsub.s32 0, %v261_v14  ;;  %v270_v16 = vsub.s32 2, %v261_v14  ;;  %v266_v18 = vsub.s32 1, %v261_v14  ;;  %v274_v19 = vsub.s32 3, %v261_v14  ;;  %s1251_s7 = sshll.u32 %s231_s26, 6 }
  0x2a   : > { %v1460_v9 = vld [vmem:[%s238_s15] sm:$0xff]   ;;  %v1461_v10 = vld [vmem:[%s238_s15 + $0x8] sm:$0xff]   ;;  %v1462_v11 = vld [vmem:[%s238_s15 + $0x10] sm:$0xff]   ;;  %s2147_s8 = scalar_lea.vmem [#allocation5], %s1251_s7  ;;  %s1312_s10 = sshll.u32 %s1726_s22, 10 }
  0x2b   : > { %368 = vmatpush1.bf16.msra.mxu0 %v1458_v7  ;;  %441 = vmatpush1.bf16.msra.mxu1 %v1459_v8  ;;  %v1463_v12 = vld [vmem:[%s238_s15 + $0x18] sm:$0xff]   ;;  %v1810_v20 = vrot.slane %v258_v17, %v262_v15  ;;  %v1812_v21 = vrot.slane %v258_v17, %v270_v16  ;;  %v1814_v22 = vrot.slane %v258_v17, %v266_v18  ;;  %s1171_s9 = sshll.u32 %s2147_s8, 4  ;;  %s2170_s13 = scalar_lea.hbm %s2220_s5, %s1312_s10  ;;  %s2165_s9 = int_to_ptr.vmem [resolvable:$true] %s1171_s9 }
  0x2c   : > { %v1816_v23 = vrot.slane %v258_v17, %v274_v19  ;;  %s2175_s14 = scalar_lea.sflag [#allocation4], %s231_s26  ;;  %s1602_s22 = scalar_lea.vmem %s2165_s9, 1024 }
  0x2d   : > { %p1603_p8 = scmp.ne.s32.totalorder %s2165_s9, %s1602_s22  ;;  %s1672_s15 = smov [#allocation5]  }
  0x2e   : > { %1266 = vmatmul.mubr.msk.bf16.vlgmr.msra.gmra.mxu0 %vm340_vm0, %v1460_v9  ;;  %1270 = vmatmul.mubr.msk.bf16.vlgmr.msra.gmra.mxu1 %vm340_vm0, %v1460_v9  ;;  %s1606_s16 = sshll.u32 %s1672_s15, 4  ;;  %s1607_s16 = int_to_ptr.vmem [resolvable:$false] %s1606_s16 }
  0x2f   : > { %395 = vmatprep.mubr.bf16.mxu0 %v1671_v0  ;;  %468 = vmatprep.mubr.bf16.mxu1 %v1671_v0  ;;  %p1604_p9 = pnand %p1603_p8, %p1743_p5  ;;  %s1608_s17 = scalar_lea.vmem %s1607_s16, 2048 }
  0x30   : > { %p1609_p11 = scmp.lt.s32.totalorder %s2165_s9, %s1607_s16  ;;  %p1610_p12 = scmp.lt.s32.totalorder %s1608_s17, %s1602_s22 }
  0x31   : > { %p1605_p10 = pneg %p1604_p9 }
  0x32   : > { %p1611_p13 = por %p1610_p12, %p1609_p11 }
  0x34   : > { %p1612_p0 = pnand %p1611_p13, %p1605_p10 }
  0x36   : > { %1267 = vmatmul.mubr.msk.bf16.gmra.mxu0 %vm340_vm0, %v1461_v10  ;;  %1271 = vmatmul.mubr.msk.bf16.gmra.mxu1 %vm340_vm0, %v1461_v10 }
  0x37   : > { %405 = vmatprep.mubr.bf16.mxu0 %v1671_v0  ;;  %478 = vmatprep.mubr.bf16.mxu1 %v1671_v0 }
  0x3e   : > { %1268 = vmatmul.mubr.msk.bf16.gmra.mxu0 %vm340_vm0, %v1462_v11  ;;  %1272 = vmatmul.mubr.msk.bf16.gmra.mxu1 %vm340_vm0, %v1462_v11 }
  0x3f   : > { %415 = vmatprep.mubr.bf16.mxu0 %v1671_v0  ;;  %488 = vmatprep.mubr.bf16.mxu1 %v1671_v0 }
  0x46   : > { %1269 = vmatmul.mubr.msk.bf16.gmra.mxu0 %vm340_vm0, %v1463_v12  ;;  %1273 = vmatmul.mubr.msk.bf16.gmra.mxu1 %vm340_vm0, %v1463_v12 }
  0xee   : > { %v387_v24 = vpop.f32.mrf.mxu0  ;;  %v460_v25 = vpop.f32.mrf.mxu1 }
  0xef   : > { %v388_v26 = vadd.f32 %v387_v24, %v1810_v20  ;;  %v461_v27 = vadd.f32 %v460_v25, %v1812_v21 }
  0xf0   : > { %v389_v28 = vpop.f32.mrf.mxu0  ;;  %v462_v29 = vpop.f32.mrf.mxu1 }
  0xf1   : > { %1496 = vtanh.f32 %v388_v26  ;;  %v390_v30 = vadd.f32 %v389_v28, %v1814_v22  ;;  %v463_v31 = vadd.f32 %v462_v29, %v1816_v23 }
  0xf2   : > { %1498 = vtanh.f32 %v461_v27  ;;  %v391_v32 = vpop.f32.mrf.mxu0  ;;  %v464_v33 = vpop.f32.mrf.mxu1 }
  0xf3   : > { %1500 = vtanh.f32 %v390_v30  ;;  %v392_v34 = vadd.f32 %v391_v32, %v1810_v20  ;;  %v465_v35 = vadd.f32 %v464_v33, %v1812_v21 }
  0xf4   : > { %1502 = vtanh.f32 %v463_v31  ;;  %v393_v36 = vpop.f32.mrf.mxu0  ;;  %v466_v37 = vpop.f32.mrf.mxu1 }
  0xf5   : > { %1504 = vtanh.f32 %v392_v34  ;;  %v394_v38 = vadd.f32 %v393_v36, %v1814_v22  ;;  %v467_v39 = vadd.f32 %v466_v37, %v1816_v23 }
  0xf6   : > { %1506 = vtanh.f32 %v465_v35  ;;  %v397_v40 = vpop.f32.mrf.mxu0  ;;  %v470_v41 = vpop.f32.mrf.mxu1 }
  0xf7   : > { %1508 = vtanh.f32 %v394_v38  ;;  %v398_v42 = vadd.f32 %v397_v40, %v1810_v20  ;;  %v471_v43 = vadd.f32 %v470_v41, %v1812_v21 }
  0xf8   : > { %1510 = vtanh.f32 %v467_v39  ;;  %v399_v44 = vpop.f32.mrf.mxu0  ;;  %v472_v45 = vpop.f32.mrf.mxu1 }
  0xf9   : > { %1512 = vtanh.f32 %v398_v42  ;;  %v400_v46 = vadd.f32 %v399_v44, %v1814_v22  ;;  %v473_v47 = vadd.f32 %v472_v45, %v1816_v23 }
  0xfa   : > { %1514 = vtanh.f32 %v471_v43  ;;  %v401_v48 = vpop.f32.mrf.mxu0  ;;  %v474_v49 = vpop.f32.mrf.mxu1 }
  0xfb   : > { %1516 = vtanh.f32 %v400_v46  ;;  %v402_v50 = vadd.f32 %v401_v48, %v1810_v20  ;;  %v475_v51 = vadd.f32 %v474_v49, %v1812_v21 }
  0xfc   : > { %1518 = vtanh.f32 %v473_v47  ;;  %v403_v52 = vpop.f32.mrf.mxu0  ;;  %v476_v53 = vpop.f32.mrf.mxu1 }
  0xfd   : > { %1520 = vtanh.f32 %v402_v50  ;;  %v404_v54 = vadd.f32 %v403_v52, %v1814_v22  ;;  %v477_v55 = vadd.f32 %v476_v53, %v1816_v23 }
  0xfe   : > { %v1834_v56 = vpop.eup %1496  ;;  %1522 = vtanh.f32 %v475_v51  ;;  %v407_v57 = vpop.f32.mrf.mxu0 }
  0xff   : > { %v480_v58 = vpop.f32.mrf.mxu1  ;;  %v1836_v59 = vpop.eup %1498  ;;  %1524 = vtanh.f32 %v404_v54  ;;  %v408_v60 = vadd.f32 %v407_v57, %v1810_v20 }
 0x100   : > { %v481_v61 = vadd.f32 %v480_v58, %v1812_v21  ;;  %v1840_v62 = vpop.eup %1500  ;;  %1526 = vtanh.f32 %v477_v55  ;;  %v409_v63 = vpop.f32.mrf.mxu0 }
 0x101   : > { %v482_v0 = vpop.f32.mrf.mxu1  ;;  %v1842_v1 = vpop.eup %1502  ;;  %1528 = vtanh.f32 %v408_v60  ;;  %v410_v2 = vadd.f32 %v409_v63, %v1814_v22  ;;  %v531_v4 = vadd.f32 %v1840_v62, %v1834_v56 }
 0x102   : > { %v483_v3 = vadd.f32 %v482_v0, %v1816_v23  ;;  %v1848_v5 = vpop.eup %1504  ;;  %1530 = vtanh.f32 %v481_v61  ;;  %v411_v6 = vpop.f32.mrf.mxu0 }
 0x103   : > { %v484_v7 = vpop.f32.mrf.mxu1  ;;  %v1850_v8 = vpop.eup %1506  ;;  %1532 = vtanh.f32 %v410_v2  ;;  %v412_v9 = vadd.f32 %v411_v6, %v1810_v20  ;;  %v532_v11 = vadd.f32 %v1836_v59, %v531_v4 }
 0x104   : > { %v485_v10 = vadd.f32 %v484_v7, %v1812_v21  ;;  %v1855_v12 = vpop.eup %1508  ;;  %1534 = vtanh.f32 %v483_v3  ;;  %v413_v13 = vpop.f32.mrf.mxu0 }
 0x105   : > { %v486_v14 = vpop.f32.mrf.mxu1  ;;  %v1857_v15 = vpop.eup %1510  ;;  %1536 = vtanh.f32 %v412_v9  ;;  %v414_v16 = vadd.f32 %v413_v13, %v1814_v22  ;;  %v533_v18 = vadd.f32 %v1842_v1, %v532_v11  ;;  %v536_v26 = vadd.f32 %v1855_v12, %v1848_v5 }
 0x106   : > { %v487_v17 = vadd.f32 %v486_v14, %v1816_v23  ;;  %v1862_v19 = vpop.eup %1512  ;;  %1538 = vtanh.f32 %v485_v10  ;;  %v417_v24 = vpop.f32.mrf.mxu0 }
 0x107   : > { %v490_v25 = vpop.f32.mrf.mxu1  ;;  %v1866_v27 = vpop.eup %1514  ;;  %1540 = vtanh.f32 %v414_v16  ;;  %v418_v28 = vadd.f32 %v417_v24, %v1810_v20  ;;  %534 = vadd.xlane.f32.xlu0 %v533_v18  ;;  %v537_v33 = vadd.f32 %v1850_v8, %v536_v26 }
 0x108   : > { %v491_v29 = vadd.f32 %v490_v25, %v1812_v21  ;;  %v1870_v30 = vpop.eup %1516  ;;  %1542 = vtanh.f32 %v487_v17  ;;  %v419_v31 = vpop.f32.mrf.mxu0 }
 0x109   : > { %v492_v32 = vpop.f32.mrf.mxu1  ;;  %v1873_v34 = vpop.eup %1518  ;;  %1544 = vtanh.f32 %v418_v28  ;;  %v420_v35 = vadd.f32 %v419_v31, %v1814_v22  ;;  %v541_v37 = vadd.f32 %v1870_v30, %v1862_v19  ;;  %v538_v41 = vadd.f32 %v1857_v15, %v537_v33  ;;  %v1464_v31 = vld [vmem:[#allocation2 + $0x78] sm:$0xff]  }
 0x10a   : > { %v493_v36 = vadd.f32 %v492_v32, %v1816_v23  ;;  %v1879_v38 = vpop.eup %1520  ;;  %1546 = vtanh.f32 %v491_v29  ;;  %v421_v39 = vpop.f32.mrf.mxu0  ;;  %v1465_v32 = vld [vmem:[#allocation2 + $0x38] sm:$0xff]   ;;  %1313 = vmatprep.subr.bf16.mxu0 %v1464_v31 }
 0x10b   : > { %v494_v40 = vpop.f32.mrf.mxu1  ;;  %v1882_v42 = vpop.eup %1522  ;;  %1548 = vtanh.f32 %v420_v35  ;;  %v422_v43 = vadd.f32 %v421_v39, %v1810_v20  ;;  %v542_v44 = vadd.f32 %v1866_v27, %v541_v37  ;;  %539 = vadd.xlane.f32.xlu0 %v538_v41  ;;  %v1466_v33 = vld [vmem:[#allocation2 + $0xf8] sm:$0xff]   ;;  %v1470_v37 = vld [vmem:[#allocation2 + $0xf0] sm:$0xff]   ;;  %1314 = vmatpush3.bf16.msra.mxu0 %v1465_v32 }
 0x10c   : > { %v1886_v45 = vpop.eup %1524  ;;  %v423_v46 = vpop.f32.mrf.mxu0  ;;  %1550 = vtanh.f32 %v493_v36  ;;  %v495_v49 = vadd.f32 %v494_v40, %v1812_v21  ;;  %v1467_v35 = vld [vmem:[#allocation2 + $0xb8] sm:$0xff]   ;;  %v1468_v36 = vld [vmem:[#allocation2 + $0x70] sm:$0xff]   ;;  %1353 = vmatprep.subr.bf16.mxu1 %v1466_v33 }
 0x10d   : > { %v496_v47 = vpop.f32.mrf.mxu1  ;;  %v1888_v48 = vpop.eup %1526  ;;  %v424_v50 = vadd.f32 %v423_v46, %v1814_v22  ;;  %v543_v51 = vadd.f32 %v1873_v34, %v542_v44  ;;  %1552 = vtanh.f32 %v422_v43  ;;  %v546_v20 = vadd.f32 %v1886_v45, %v1879_v38  ;;  %1354 = vmatpush3.bf16.msra.mxu1 %v1467_v35  ;;  %v1469_v39 = vld [vmem:[#allocation2 + $0x30] sm:$0xff]   ;;  %1315 = vmatprep.subr.bf16.mxu0 %v1468_v36 }
 0x10e   : > { %v1893_v52 = vpop.eup %1528  ;;  %v497_v54 = vadd.f32 %v496_v47, %v1816_v23  ;;  %1355 = vmatprep.subr.bf16.mxu1 %v1470_v37 }
 0x10f   : > { %v1897_v53 = vpop.eup %1530  ;;  %1554 = vtanh.f32 %v424_v50  ;;  %544 = vadd.xlane.f32.xlu1 %v543_v51  ;;  %v547_v21 = vadd.f32 %v1882_v42, %v546_v20  ;;  %1316 = vmatpush3.bf16.msra.mxu0 %v1469_v39 }
 0x110   : > { %v1900_v55 = vpop.eup %1532  ;;  %1556 = vtanh.f32 %v495_v49 }
 0x111   : > { %v1903_v57 = vpop.eup %1534  ;;  %v551_v22 = vadd.f32 %v1900_v55, %v1893_v52  ;;  %v548_v60 = vadd.f32 %v1888_v48, %v547_v21  ;;  %1558 = vtanh.f32 %v497_v54 }
 0x112   : > { %v1907_v58 = vpop.eup %1536 }
 0x113   : > { %v1910_v61 = vpop.eup %1538  ;;  %v552_v23 = vadd.f32 %v1897_v53, %v551_v22  ;;  %549 = vadd.xlane.f32.xlu1 %v548_v60 }
 0x114   : > { %v1913_v63 = vpop.eup %1540 }
 0x115   : > { %v1915_v0 = vpop.eup %1542  ;;  %v553_v2 = vadd.f32 %v1903_v57, %v552_v23  ;;  %v556_v3 = vadd.f32 %v1913_v63, %v1907_v58 }
 0x116   : > { %v1920_v4 = vpop.eup %1544 }
 0x117   : > { %v1922_v6 = vpop.eup %1546  ;;  %554 = vadd.xlane.f32.xlu0 %v553_v2  ;;  %v557_v7 = vadd.f32 %v1910_v61, %v556_v3 }
 0x118   : > { %v1925_v9 = vpop.eup %1548 }
 0x119   : > { %v558_v10 = vadd.f32 %v1915_v0, %v557_v7  ;;  %v561_v11 = vadd.f32 %v1925_v9, %v1920_v4  ;;  %v1930_v13 = vpop.eup %1550 }
 0x11a   : > { %v1932_v14 = vpop.eup %1552 }
 0x11b   : > { %559 = vadd.xlane.f32.xlu1 %v558_v10  ;;  %v562_v16 = vadd.f32 %v1922_v6, %v561_v11 }
 0x11c   : > { %v1935_v17 = vpop.eup %1554 }
 0x11d   : > { %v563_v18 = vadd.f32 %v1930_v13, %v562_v16  ;;  %v566_v24 = vadd.f32 %v1935_v17, %v1932_v14  ;;  %v1940_v25 = vpop.eup %1556 }
 0x11e   : > { %v1943_v28 = vpop.eup %1558 }
 0x11f   : > { %564 = vadd.xlane.f32.xlu0 %v563_v18  ;;  %v567_v26 = vadd.f32 %v1940_v25, %v566_v24 }
 0x121   : > { %v568_v29 = vadd.f32 %v1943_v28, %v567_v26 }
 0x123   : > { %569 = vadd.xlane.f32.xlu1 %v568_v29 }
 0x190   : > { %v535_v40 = vpop.xlane.xlu0 %534 }
 0x191   : > { %v572_v41 = vmul.f32 0.001953125, %v535_v40 }
 0x193   : > { %v1947_v43 = vsub.f32 %v1834_v56, %v572_v41  ;;  %v1950_v44 = vsub.f32 %v1840_v62, %v572_v41  ;;  %v1953_v46 = vsub.f32 %v1836_v59, %v572_v41  ;;  %v1956_v49 = vsub.f32 %v1842_v1, %v572_v41 }
 0x194   : > { %v540_v47 = vpop.xlane.xlu0 %539 }
 0x195   : > { %v612_v50 = vmul.f32 %v1947_v43, %v1947_v43  ;;  %v613_v51 = vmul.f32 %v1950_v44, %v1950_v44  ;;  %v573_v20 = vmul.f32 0.001953125, %v540_v47  ;;  %v614_v56 = vmul.f32 %v1953_v46, %v1953_v46 }
 0x196   : > { %v615_v60 = vmul.f32 %v1956_v49, %v1956_v49 }
 0x197   : > { %v644_v54 = vadd.f32 %v613_v51, %v612_v50  ;;  %v1965_v62 = vsub.f32 %v1848_v5, %v573_v20  ;;  %v1968_v59 = vsub.f32 %v1855_v12, %v573_v20  ;;  %v1971_v1 = vsub.f32 %v1850_v8, %v573_v20 }
 0x198   : > { %v545_v21 = vpop.xlane.xlu1 %544  ;;  %v1976_v2 = vsub.f32 %v1857_v15, %v573_v20 }
 0x199   : > { %v574_v22 = vmul.f32 0.001953125, %v545_v21  ;;  %v645_v23 = vadd.f32 %v644_v54, %v614_v56  ;;  %v616_v3 = vmul.f32 %v1965_v62, %v1965_v62  ;;  %v617_v5 = vmul.f32 %v1968_v59, %v1968_v59 }
 0x19a   : > { %v618_v15 = vmul.f32 %v1971_v1, %v1971_v1 }
 0x19b   : > { %v1983_v12 = vsub.f32 %v1862_v19, %v574_v22  ;;  %v1986_v8 = vsub.f32 %v1870_v30, %v574_v22  ;;  %v646_v7 = vadd.f32 %v645_v23, %v615_v60  ;;  %v1989_v10 = vsub.f32 %v1866_v27, %v574_v22 }
 0x19c   : > { %v649_v11 = vadd.f32 %v617_v5, %v616_v3  ;;  %v550_v16 = vpop.xlane.xlu1 %549  ;;  %v1994_v18 = vsub.f32 %v1873_v34, %v574_v22  ;;  %v619_v27 = vmul.f32 %v1976_v2, %v1976_v2 }
 0x19d   : > { %647 = vadd.xlane.f32.xlu0 %v646_v7  ;;  %v620_v19 = vmul.f32 %v1983_v12, %v1983_v12  ;;  %v621_v30 = vmul.f32 %v1986_v8, %v1986_v8  ;;  %v575_v24 = vmul.f32 0.001953125, %v550_v16  ;;  %v622_v29 = vmul.f32 %v1989_v10, %v1989_v10  ;;  %v1471_v7 = vld [vmem:[#allocation2 + $0xb0] sm:$0xff]  }
 0x19e   : > { %v650_v26 = vadd.f32 %v649_v11, %v618_v15  ;;  %v623_v39 = vmul.f32 %v1994_v18, %v1994_v18  ;;  %1356 = vmatpush3.bf16.msra.mxu1 %v1471_v7 }
 0x19f   : > { %v654_v31 = vadd.f32 %v621_v30, %v620_v19  ;;  %v2005_v32 = vsub.f32 %v1879_v38, %v575_v24  ;;  %v2008_v34 = vsub.f32 %v1886_v45, %v575_v24  ;;  %v2011_v36 = vsub.f32 %v1882_v42, %v575_v24 }
 0x1a0   : > { %v555_v33 = vpop.xlane.xlu0 %554  ;;  %v651_v35 = vadd.f32 %v650_v26, %v619_v27  ;;  %v2016_v41 = vsub.f32 %v1888_v48, %v575_v24  ;;  %v1472_v27 = vld [vmem:[#allocation2 + $0x68] sm:$0xff]  }
 0x1a1   : > { %v576_v37 = vmul.f32 0.001953125, %v555_v33  ;;  %v655_v40 = vadd.f32 %v654_v31, %v622_v29  ;;  %v624_v38 = vmul.f32 %v2005_v32, %v2005_v32  ;;  %v625_v45 = vmul.f32 %v2008_v34, %v2008_v34  ;;  %v1474_v26 = vld [vmem:[#allocation2 + $0xe8] sm:$0xff]   ;;  %1317 = vmatprep.subr.bf16.mxu0 %v1472_v27  ;;  %v1484_v27 = vld [vmem:[#allocation2 + $0x50] sm:$0xff]  }
 0x1a2   : > { %652 = vadd.xlane.f32.xlu1 %v651_v35  ;;  %v626_v20 = vmul.f32 %v2011_v36, %v2011_v36  ;;  %v627_v22 = vmul.f32 %v2016_v41, %v2016_v41  ;;  %v1473_v35 = vld [vmem:[#allocation2 + $0x28] sm:$0xff]   ;;  %1357 = vmatprep.subr.bf16.mxu1 %v1474_v26  ;;  %v1486_v26 = vld [vmem:[#allocation2 + $0xd0] sm:$0xff]  }
 0x1a3   : > { %v2023_v47 = vsub.f32 %v1893_v52, %v576_v37  ;;  %v2026_v42 = vsub.f32 %v1900_v55, %v576_v37  ;;  %v656_v50 = vadd.f32 %v655_v40, %v623_v39  ;;  %v659_v56 = vadd.f32 %v625_v45, %v624_v38  ;;  %1318 = vmatpush3.bf16.msra.mxu0 %v1473_v35  ;;  %v1487_v35 = vld [vmem:[#allocation2 + $0x90] sm:$0xff]  }
 0x1a4   : > { %v560_v51 = vpop.xlane.xlu1 %559  ;;  %v2031_v48 = vsub.f32 %v1897_v53, %v576_v37  ;;  %v2034_v54 = vsub.f32 %v1903_v57, %v576_v37  ;;  %v1475_v37 = vld [vmem:[#allocation2 + $0xa8] sm:$0xff]  }
 0x1a5   : > { %v577_v21 = vmul.f32 0.001953125, %v560_v51  ;;  %657 = vadd.xlane.f32.xlu0 %v656_v50  ;;  %v628_v52 = vmul.f32 %v2023_v47, %v2023_v47  ;;  %v629_v55 = vmul.f32 %v2026_v42, %v2026_v42  ;;  %v660_v60 = vadd.f32 %v659_v56, %v626_v20  ;;  %1358 = vmatpush3.bf16.msra.mxu1 %v1475_v37  ;;  %v1478_v56 = vld [vmem:[#allocation2 + $0xe0] sm:$0xff]   ;;  %v1488_v37 = vld [vmem:[#allocation2 + $0x48] sm:$0xff]  }
 0x1a6   : > { %v630_v23 = vmul.f32 %v2031_v48, %v2031_v48  ;;  %v631_v16 = vmul.f32 %v2034_v54, %v2034_v54  ;;  %1359 = vmatprep.subr.bf16.mxu1 %v1478_v56 }
 0x1a7   : > { %v2045_v53 = vsub.f32 %v1907_v58, %v577_v21  ;;  %v2048_v57 = vsub.f32 %v1913_v63, %v577_v21  ;;  %v664_v3 = vadd.f32 %v629_v55, %v628_v52  ;;  %v2051_v5 = vsub.f32 %v1910_v61, %v577_v21 }
 0x1a8   : > { %v565_v15 = vpop.xlane.xlu0 %564  ;;  %v661_v11 = vadd.f32 %v660_v60, %v627_v22  ;;  %v2056_v19 = vsub.f32 %v1915_v0, %v577_v21  ;;  %v1477_v22 = vld [vmem:[#allocation2 + $0x20] sm:$0xff]  }
 0x1a9   : > { %v578_v30 = vmul.f32 0.001953125, %v565_v15  ;;  %v665_v24 = vadd.f32 %v664_v3, %v630_v23  ;;  %v632_v58 = vmul.f32 %v2045_v53, %v2045_v53  ;;  %v633_v63 = vmul.f32 %v2048_v57, %v2048_v57  ;;  %v1479_v60 = vld [vmem:[#allocation2 + $0xa0] sm:$0xff]  }
 0x1aa   : > { %662 = vadd.xlane.f32.xlu1 %v661_v11  ;;  %v634_v61 = vmul.f32 %v2051_v5, %v2051_v5  ;;  %v635_v40 = vmul.f32 %v2056_v19, %v2056_v19  ;;  %1360 = vmatpush3.bf16.msra.mxu1 %v1479_v60  ;;  %v1480_v11 = vld [vmem:[#allocation2 + $0x58] sm:$0xff]  }
 0x1ab   : > { %v2065_v29 = vsub.f32 %v1920_v4, %v578_v30  ;;  %v2068_v0 = vsub.f32 %v1925_v9, %v578_v30  ;;  %v666_v31 = vadd.f32 %v665_v24, %v631_v16  ;;  %v669_v33 = vadd.f32 %v633_v63, %v632_v58  ;;  %v1482_v16 = vld [vmem:[#allocation2 + $0xd8] sm:$0xff]  }
 0x1ac   : > { %v570_v39 = vpop.xlane.xlu1 %569  ;;  %v2073_v38 = vsub.f32 %v1922_v6, %v578_v30  ;;  %v2076_v45 = vsub.f32 %v1930_v13, %v578_v30  ;;  %v1476_v6 = vld [vmem:[#allocation2 + $0x60] sm:$0xff]   ;;  %v1481_v24 = vld [vmem:[#allocation2 + $0x18] sm:$0xff]   ;;  %1361 = vmatprep.subr.bf16.mxu1 %v1482_v16 }
 0x1ad   : > { %v579_v4 = vmul.f32 0.001953125, %v570_v39  ;;  %667 = vadd.xlane.f32.xlu0 %v666_v31  ;;  %v670_v9 = vadd.f32 %v669_v33, %v634_v61  ;;  %v636_v50 = vmul.f32 %v2065_v29, %v2065_v29  ;;  %v637_v51 = vmul.f32 %v2068_v0, %v2068_v0  ;;  %1319 = vmatprep.subr.bf16.mxu0 %v1476_v6  ;;  %v1483_v58 = vld [vmem:[#allocation2 + $0x98] sm:$0xff]   ;;  %v1485_v33 = vld [vmem:[#allocation2 + $0x10] sm:$0xff]   ;;  %v1490_v39 = vld [vmem:[#allocation2 + $0xc8] sm:$0xff]  }
 0x1ae   : > { %v638_v20 = vmul.f32 %v2073_v38, %v2073_v38  ;;  %v639_v23 = vmul.f32 %v2076_v45, %v2076_v45  ;;  %1320 = vmatpush3.bf16.msra.mxu0 %v1477_v22  ;;  %1362 = vmatpush3.bf16.msra.mxu1 %v1483_v58 }
 0x1af   : > { %v2085_v13 = vsub.f32 %v1932_v14, %v579_v4  ;;  %v2088_v21 = vsub.f32 %v1935_v17, %v579_v4  ;;  %v671_v52 = vadd.f32 %v670_v9, %v635_v40  ;;  %v674_v55 = vadd.f32 %v637_v51, %v636_v50  ;;  %1321 = vmatprep.subr.bf16.mxu0 %v1480_v11  ;;  %v1489_v40 = vld [vmem:[#allocation2 + $0x8] sm:$0xff]   ;;  %v1492_v9 = vld [vmem:[#allocation2 + $0x40] sm:$0xff]  }
 0x1b0   : > { %v2093_v3 = vsub.f32 %v1940_v25, %v579_v4  ;;  %v2096_v7 = vsub.f32 %v1943_v28, %v579_v4  ;;  %1363 = vmatprep.subr.bf16.mxu1 %v1486_v26  ;;  %v1491_v4 = vld [vmem:[#allocation2 + $0x88] sm:$0xff]   ;;  %v1494_v50 = vld [vmem:[#allocation2 + $0xc0] sm:$0xff]  }
 0x1b1   : > { %672 = vadd.xlane.f32.xlu1 %v671_v52  ;;  %v675_v14 = vadd.f32 %v674_v55, %v638_v20  ;;  %v640_v17 = vmul.f32 %v2085_v13, %v2085_v13  ;;  %v641_v15 = vmul.f32 %v2088_v21, %v2088_v21  ;;  %v1493_v51 = vld [vmem:[#allocation2] sm:$0xff]  }
 0x1b2   : > { %v642_v25 = vmul.f32 %v2093_v3, %v2093_v3  ;;  %v643_v63 = vmul.f32 %v2096_v7, %v2096_v7  ;;  %1322 = vmatpush3.bf16.msra.mxu0 %v1481_v24  ;;  %1364 = vmatpush3.bf16.msra.mxu1 %v1487_v35  ;;  %v1495_v20 = vld [vmem:[#allocation2 + $0x80] sm:$0xff]  }
 0x1b3   : > { %v676_v30 = vadd.f32 %v675_v14, %v639_v23  ;;  %v679_v28 = vadd.f32 %v641_v15, %v640_v17  ;;  %1323 = vmatprep.subr.bf16.mxu0 %v1484_v27  ;;  %1365 = vmatprep.subr.bf16.mxu1 %v1490_v39 }
 0x1b5   : > { %677 = vadd.xlane.f32.xlu0 %v676_v30  ;;  %v680_v61 = vadd.f32 %v679_v28, %v642_v25 }
 0x1b6   : > { %1324 = vmatpush3.bf16.msra.mxu0 %v1485_v33  ;;  %1366 = vmatpush3.bf16.msra.mxu1 %v1491_v4 }
 0x1b7   : > { %v681_v31 = vadd.f32 %v680_v61, %v643_v63  ;;  %1325 = vmatprep.subr.bf16.mxu0 %v1488_v37  ;;  %1367 = vmatprep.subr.bf16.mxu1 %v1494_v50 }
 0x1b9   : > { %682 = vadd.xlane.f32.xlu1 %v681_v31 }
 0x1ba   : > { %1326 = vmatpush3.bf16.msra.mxu0 %v1489_v40  ;;  %1368 = vmatpush3.bf16.msra.mxu1 %v1495_v20 }
 0x1bb   : > { %1327 = vmatprep.subr.bf16.mxu0 %v1492_v9 }
 0x1be   : > { %1328 = vmatpush3.bf16.msra.mxu0 %v1493_v51 }
 0x226   : > { %v648_v6 = vpop.xlane.xlu0 %647 }
 0x227   : > { %v684_v56 = vmul.f32 0.001953125, %v648_v6 }
 0x229   : > { %v692_v52 = vadd.f32 1e-05, %v684_v56 }
 0x22b   : > { %v653_v55 = vpop.xlane.xlu1 %652  ;;  %1560 = vrsqrt.f32 %v692_v52 }
 0x22c   : > { %v685_v22 = vmul.f32 0.001953125, %v653_v55 }
 0x22e   : > { %v693_v60 = vadd.f32 1e-05, %v685_v22  ;;  %v658_v23 = vpop.xlane.xlu0 %657 }
 0x22f   : > { %v686_v14 = vmul.f32 0.001953125, %v658_v23 }
 0x230   : > { %1562 = vrsqrt.f32 %v693_v60 }
 0x231   : > { %v694_v17 = vadd.f32 1e-05, %v686_v14 }
 0x233   : > { %v663_v15 = vpop.xlane.xlu1 %662  ;;  %1564 = vrsqrt.f32 %v694_v17 }
 0x234   : > { %v687_v11 = vmul.f32 0.001953125, %v663_v15 }
 0x236   : > { %v695_v16 = vadd.f32 1e-05, %v687_v11  ;;  %v668_v30 = vpop.xlane.xlu0 %667 }
 0x237   : > { %v688_v25 = vmul.f32 0.001953125, %v668_v30 }
 0x238   : > { %1566 = vrsqrt.f32 %v695_v16  ;;  %v1561_v28 = vpop.eup %1560 }
 0x239   : > { %v696_v24 = vadd.f32 1e-05, %v688_v25  ;;  %v709_v61 = vmul.f32 %v1561_v28, %v1950_v44  ;;  %v711_v31 = vmul.f32 %v1561_v28, %v1956_v49  ;;  %v708_v33 = vmul.f32 %v1561_v28, %v1947_v43 }
 0x23a   : > { %v673_v58 = vpop.xlane.xlu1 %672  ;;  %v710_v35 = vmul.f32 %v1561_v28, %v1953_v46 }
 0x23b   : > { %v689_v63 = vmul.f32 0.001953125, %v673_v58  ;;  %1568 = vrsqrt.f32 %v696_v24 }
 0x23d   : > { %v1563_v27 = vpop.eup %1562  ;;  %v697_v26 = vadd.f32 1e-05, %v689_v63 }
 0x23e   : > { %v678_v37 = vpop.xlane.xlu0 %677  ;;  %v713_v39 = vmul.f32 %v1563_v27, %v1968_v59  ;;  %v715_v40 = vmul.f32 %v1563_v27, %v1976_v2  ;;  %v712_v4 = vmul.f32 %v1563_v27, %v1965_v62  ;;  %v714_v9 = vmul.f32 %v1563_v27, %v1971_v1 }
 0x23f   : > { %1570 = vrsqrt.f32 %v697_v26  ;;  %v690_v50 = vmul.f32 0.001953125, %v678_v37 }
 0x240   : > { %v741_v44 = vpack.c.bf16 %v713_v39, %v709_v61  ;;  %v743_v51 = vpack.c.bf16 %v715_v40, %v711_v31  ;;  %v740_v20 = vpack.c.bf16 %v712_v4, %v708_v33  ;;  %v742_v6 = vpack.c.bf16 %v714_v9, %v710_v35  ;;  %v1565_v49 = vpop.eup %1564 }
 0x241   : > { %v698_v56 = vadd.f32 1e-05, %v690_v50  ;;  %v717_v59 = vmul.f32 %v1565_v49, %v1986_v8  ;;  %v719_v1 = vmul.f32 %v1565_v49, %v1994_v18  ;;  %v716_v52 = vmul.f32 %v1565_v49, %v1983_v12 }
 0x242   : > { %1051 = vmatprep.mubr.bf16.mxu0 %v741_v44  ;;  %1116 = vmatprep.mubr.bf16.mxu1 %v743_v51  ;;  %v683_v43 = vpop.xlane.xlu1 %682  ;;  %v718_v55 = vmul.f32 %v1565_v49, %v1989_v10 }
 0x243   : > { %v691_v46 = vmul.f32 0.001953125, %v683_v43  ;;  %1052 = vmatmul.mubr.bf16.vlgmr.msra.gmra.mxu0 %v740_v20  ;;  %1117 = vmatmul.mubr.bf16.vlgmr.msra.gmra.mxu1 %v742_v6  ;;  %1572 = vrsqrt.f32 %v698_v56 }
 0x245   : > { %v1567_v62 = vpop.eup %1566  ;;  %v699_v2 = vadd.f32 1e-05, %v691_v46 }
 0x246   : > { %v721_v22 = vmul.f32 %v1567_v62, %v2008_v34  ;;  %v723_v60 = vmul.f32 %v1567_v62, %v2016_v41  ;;  %v720_v23 = vmul.f32 %v1567_v62, %v2005_v32  ;;  %v722_v14 = vmul.f32 %v1567_v62, %v2011_v36 }
 0x247   : > { %1574 = vrsqrt.f32 %v699_v2 }
 0x248   : > { %v745_v17 = vpack.c.bf16 %v721_v22, %v717_v59  ;;  %v747_v15 = vpack.c.bf16 %v723_v60, %v719_v1  ;;  %v744_v8 = vpack.c.bf16 %v720_v23, %v716_v52  ;;  %v746_v11 = vpack.c.bf16 %v722_v14, %v718_v55  ;;  %v1569_v16 = vpop.eup %1568 }
 0x249   : > { %v725_v10 = vmul.f32 %v1569_v16, %v2026_v42  ;;  %v727_v18 = vmul.f32 %v1569_v16, %v2034_v54  ;;  %v724_v34 = vmul.f32 %v1569_v16, %v2023_v47  ;;  %v726_v32 = vmul.f32 %v1569_v16, %v2031_v48 }
 0x24a   : > { %1059 = vmatprep.mubr.bf16.mxu0 %v745_v17  ;;  %1124 = vmatprep.mubr.bf16.mxu1 %v747_v15 }
 0x24b   : > { %1060 = vmatmul.mubr.bf16.gmra.mxu0 %v744_v8  ;;  %1125 = vmatmul.mubr.bf16.gmra.mxu1 %v746_v11 }
 0x24c   : > { %v1571_v12 = vpop.eup %1570 }
 0x24d   : > { %v729_v36 = vmul.f32 %v1571_v12, %v2048_v57  ;;  %v731_v41 = vmul.f32 %v1571_v12, %v2056_v19  ;;  %v728_v30 = vmul.f32 %v1571_v12, %v2045_v53  ;;  %v730_v25 = vmul.f32 %v1571_v12, %v2051_v5 }
 0x24f   : > { %v749_v28 = vpack.c.bf16 %v729_v36, %v725_v10  ;;  %v751_v24 = vpack.c.bf16 %v731_v41, %v727_v18  ;;  %v748_v58 = vpack.c.bf16 %v728_v30, %v724_v34  ;;  %v750_v63 = vpack.c.bf16 %v730_v25, %v726_v32 }
 0x250   : > { %v1573_v61 = vpop.eup %1572 }
 0x251   : > { %1067 = vmatprep.mubr.bf16.mxu0 %v749_v28  ;;  %1132 = vmatprep.mubr.bf16.mxu1 %v751_v24  ;;  %v733_v42 = vmul.f32 %v1573_v61, %v2068_v0  ;;  %v735_v48 = vmul.f32 %v1573_v61, %v2076_v45  ;;  %v732_v54 = vmul.f32 %v1573_v61, %v2065_v29 }
 0x252   : > { %v734_v53 = vmul.f32 %v1573_v61, %v2073_v38  ;;  %v2142_v38 = vld [vmem:[%s2219_s4] ss:$0 sm:$0xff] }
 0x253   : > { %1068 = vmatmul.mubr.bf16.gmra.mxu0 %v748_v58  ;;  %1133 = vmatmul.mubr.bf16.gmra.mxu1 %v750_v63 }
 0x254   : > { %v1575_v47 = vpop.eup %1574 }
 0x255   : > { %v737_v57 = vmul.f32 %v1575_v47, %v2088_v21  ;;  %v739_v5 = vmul.f32 %v1575_v47, %v2096_v7  ;;  %v736_v19 = vmul.f32 %v1575_v47, %v2085_v13  ;;  %v738_v27 = vmul.f32 %v1575_v47, %v2093_v3 }
 0x257   : > { %v753_v26 = vpack.c.bf16 %v737_v57, %v733_v42  ;;  %v755_v31 = vpack.c.bf16 %v739_v5, %v735_v48  ;;  %v752_v33 = vpack.c.bf16 %v736_v19, %v732_v54  ;;  %v754_v0 = vpack.c.bf16 %v738_v27, %v734_v53 }
 0x259   : > { %1075 = vmatprep.mubr.bf16.mxu0 %v753_v26  ;;  %1140 = vmatprep.mubr.bf16.mxu1 %v755_v31 }
 0x25b   : > { %1076 = vmatmul.mubr.bf16.gmra.mxu0 %v752_v33  ;;  %1141 = vmatmul.mubr.bf16.gmra.mxu1 %v754_v0 }
 0x303   : > { %v1329_v29 = vpop.f32.mrf.mxu0  ;;  %v1369_v45 = vpop.f32.mrf.mxu1 }
 0x305   : > { %v1330_v13 = vpop.f32.mrf.mxu0  ;;  %v1370_v21 = vpop.f32.mrf.mxu1 }
 0x306   : > { %v1331_v3 = vadd.f32 %v1330_v13, %v1329_v29  ;;  %v1371_v39 = vadd.f32 %v1370_v21, %v1369_v45 }
 0x307   : > { %v1332_v7 = vpop.f32.mrf.mxu0  ;;  %v1372_v35 = vpop.f32.mrf.mxu1 }
 0x308   : > { %v1054_v37 = vadd.f32 %v1331_v3, %v2142_v38 }
 0x309   : > { %v1333_v40 = vpop.f32.mrf.mxu0  ;;  %v1373_v4 = vpop.f32.mrf.mxu1 }
 0x30a   : > { %v1119_v9 = vadd.f32 %v1371_v39, %v1054_v37  ;;  %v1334_v50 = vadd.f32 %v1333_v40, %v1332_v7  ;;  %v1374_v6 = vadd.f32 %v1373_v4, %v1372_v35 }
 0x30b   : > { %v1335_v44 = vpop.f32.mrf.mxu0  ;;  %v1375_v51 = vpop.f32.mrf.mxu1 }
 0x30c   : > { %1149 = vst [vmem:[%s2147_s8] sm:$0xff] %v1119_v9  ;;  %v1057_v20 = vadd.f32 %v1334_v50, %v2142_v38 }
 0x30d   : > { %v1336_v49 = vpop.f32.mrf.mxu0  ;;  %v1376_v56 = vpop.f32.mrf.mxu1 }
 0x30e   : > { %v1122_v43 = vadd.f32 %v1374_v6, %v1057_v20  ;;  %v1337_v46 = vadd.f32 %v1336_v49, %v1335_v44  ;;  %v1377_v1 = vadd.f32 %v1376_v56, %v1375_v51 }
 0x30f   : > { %v1338_v59 = vpop.f32.mrf.mxu0  ;;  %v1378_v62 = vpop.f32.mrf.mxu1 }
 0x310   : > { %1150 = vst [vmem:[%s2147_s8 + $0x8] sm:$0xff] %v1122_v43  ;;  %v1062_v2 = vadd.f32 %v1337_v46, %v2142_v38 }
 0x311   : > { %v1339_v52 = vpop.f32.mrf.mxu0  ;;  %v1379_v55 = vpop.f32.mrf.mxu1 }
 0x312   : > { %v1127_v22 = vadd.f32 %v1377_v1, %v1062_v2  ;;  %v1340_v60 = vadd.f32 %v1339_v52, %v1338_v59  ;;  %v1380_v15 = vadd.f32 %v1379_v55, %v1378_v62 }
 0x313   : > { %v1341_v23 = vpop.f32.mrf.mxu0  ;;  %v1381_v14 = vpop.f32.mrf.mxu1 }
 0x314   : > { %1151 = vst [vmem:[%s2147_s8 + $0x10] sm:$0xff] %v1127_v22  ;;  %v1065_v17 = vadd.f32 %v1340_v60, %v2142_v38 }
 0x315   : > { %v1342_v8 = vpop.f32.mrf.mxu0  ;;  %v1382_v11 = vpop.f32.mrf.mxu1 }
 0x316   : > { %v1130_v16 = vadd.f32 %v1380_v15, %v1065_v17  ;;  %v1343_v12 = vadd.f32 %v1342_v8, %v1341_v23  ;;  %v1383_v32 = vadd.f32 %v1382_v11, %v1381_v14 }
 0x317   : > { %v1344_v10 = vpop.f32.mrf.mxu0  ;;  %v1384_v18 = vpop.f32.mrf.mxu1 }
 0x318   : > { %1152 = vst [vmem:[%s2147_s8 + $0x18] sm:$0xff] %v1130_v16  ;;  %v1070_v34 = vadd.f32 %v1343_v12, %v2142_v38 }
 0x319   : > { %v1345_v36 = vpop.f32.mrf.mxu0  ;;  %v1385_v41 = vpop.f32.mrf.mxu1 }
 0x31a   : > { %v1135_v30 = vadd.f32 %v1383_v32, %v1070_v34  ;;  %v1346_v25 = vadd.f32 %v1345_v36, %v1344_v10  ;;  %v1386_v63 = vadd.f32 %v1385_v41, %v1384_v18 }
 0x31b   : > { %v1347_v28 = vpop.f32.mrf.mxu0  ;;  %v1387_v24 = vpop.f32.mrf.mxu1 }
 0x31c   : > { %1153 = vst [vmem:[%s2147_s8 + $0x20] sm:$0xff] %v1135_v30  ;;  %v1073_v58 = vadd.f32 %v1346_v25, %v2142_v38 }
 0x31d   : > { %v1348_v61 = vpop.f32.mrf.mxu0  ;;  %v1388_v47 = vpop.f32.mrf.mxu1 }
 0x31e   : > { %v1138_v42 = vadd.f32 %v1386_v63, %v1073_v58  ;;  %v1349_v48 = vadd.f32 %v1348_v61, %v1347_v28  ;;  %v1389_v5 = vadd.f32 %v1388_v47, %v1387_v24 }
 0x31f   : > { %v1350_v54 = vpop.f32.mrf.mxu0  ;;  %v1390_v53 = vpop.f32.mrf.mxu1 }
 0x320   : > { %1154 = vst [vmem:[%s2147_s8 + $0x28] sm:$0xff] %v1138_v42  ;;  %v1078_v57 = vadd.f32 %v1349_v48, %v2142_v38 }
 0x321   : > { %v1351_v19 = vpop.f32.mrf.mxu0  ;;  %v1391_v27 = vpop.f32.mrf.mxu1 }
 0x322   : > { %v1143_v26 = vadd.f32 %v1389_v5, %v1078_v57  ;;  %v1352_v31 = vadd.f32 %v1351_v19, %v1350_v54  ;;  %v1392_v0 = vadd.f32 %v1391_v27, %v1390_v53 }
 0x324   : > { %1155 = vst [vmem:[%s2147_s8 + $0x30] sm:$0xff] %v1143_v26  ;;  %v1081_v33 = vadd.f32 %v1352_v31, %v2142_v38 }
 0x326   : > { %v1146_v29 = vadd.f32 %v1392_v0, %v1081_v33 }
 0x328   : > { %1156 = vst [vmem:[%s2147_s8 + $0x38] sm:$0xff] %v1146_v29 }
 0x329   : > { %1615 = shalt.err (!%p1612_p0)
}
 0x32a   : > { %s1616_s23 = scalar_lea.hbm %s2170_s13, 1024  ;;  %s1620_s30 = scalar_lea.hbm %s2220_s5, 4096 }
 0x32b   : > { %p1617_p1 = scmp.ne.s32.totalorder %s2170_s13, %s1616_s23  ;;  %p1621_p4 = scmp.lt.s32.totalorder %s2170_s13, %s2220_s5 }
 0x32c   : > { %p1622_p7 = scmp.lt.s32.totalorder %s1620_s30, %s1616_s23 }
 0x32d   : > { %p1618_p2 = pnand %p1617_p1, %p1743_p5 }
 0x32e   : > { %p1623_p6 = por %p1622_p7, %p1621_p4 }
 0x32f   : > { %p1619_p3 = pneg %p1618_p2 }
 0x331   : > { %p1624_p8 = pnand %p1623_p6, %p1619_p3 }
 0x333   : > { %1627 = shalt.err (!%p1624_p8)
}
 0x334   : > { %s1673_s8 = smov 128   ;;  %s1674_s10 = smov 8  }
 0x335   : > { %1397 = dma.vmem_to_hbm [thread:$0]  (%p1743_p5), %s2165_s9, 1024, %s2170_s13, %s2175_s14, %s1673_s8, %s1673_s8, %s1674_s10  }
 0x336 PF: > { %p1409_p9 = scmp.ge.s32.totalorder %s1666_s21, 2  ;;  %s1186_s11 = sand.u32 1, %s1654_s18  }
 0x337   : > { %p2224_p10 = scmp.ne.s32.totalorder %s2222_s29, 0  ;;  %s1187_s12 = scalar_lea.sflag [#allocation4], %s1186_s11 }
 0x339   : > { %p1404_p11 = pnand %p1409_p9, %p2224_p10 }
 0x33b   : > { %p1405_p12 = pneg %p1404_p11 }
 0x33d   : > { %1649 = dma.done.wait (%p1405_p12), %s1187_s12, 1024  }
 0x33e   : > { %1651 = vsyncadd (%p1405_p12), %s1187_s12, 4294966272  ;;  %p16_p13 = scmp.ge.s32.totalorder %s1730_s24, 6   ;;  %s2225_s18 = smov %s1658_s19 }
 0x33f   : > { %s2226_s19 = smov %s1662_s20  ;;  %s2227_s20 = smov %s1741_s27 }
 0x340   : > { %s2228_s21 = smov %s1730_s24  ;;  %18 = sbr.rel (!%p16_p13) target bundleno = 4 (0x4), region = 80 }
 0x345   :  { %1192 = vsyncpa [#allocation3], 1 }
 0x346   :  { %1194 = vsyncpa [#allocation3 + $0x1], 1 }
 0x347   :  { %1195 = vsyncpa [#allocation4], 1 }
 0x348   :  { %1197 = vsyncpa [#allocation4 + $0x1], 1 }

</bundles_post_ra>
